<compile_context>
chip_gen: v7x
topology: tpu7x:2x2x1
jax: 0.10.0
libtpu: 0.0.40
codegen_flags: <defaults>
</compile_context>

<pallas_src>
import functools

import numpy as np
import jax
import jax.numpy as jnp
from jax.experimental import pallas as pl
from jax.experimental.pallas import tpu as pltpu


_LANE = 128
_SUBLANE = 8


def _round_up(x, m):
    return (x + m - 1) // m * m


@functools.lru_cache(maxsize=None)
def _vmem_budget_and_limit():
    """(double-buffer budget, compiler vmem limit) sized per chip generation."""
    try:
        cap = int(pltpu.get_tpu_info().vmem_capacity_bytes)
    except Exception:
        cap = 64 << 20                       # assume most constrained (v7x/TC)
    if cap >= (128 << 20):                   # v5e / v6e: 128 MiB
        return 64 << 20, 100 << 20
    return 32 << 20, 48 << 20                # v7x: 64 MiB per TensorCore


def _pick_layer_block(num_layers, per_layer_vmem_bytes, budget, min_steps=4):
    """Largest divisor of num_layers that (a) fits the double-buffered VMEM
    budget, (b) keeps >= min_steps grid steps for pipelining / megacore, and
    (c) prefers an even grid length (v7x's two TensorCores)."""
    fits = [d for d in range(1, num_layers + 1)
            if num_layers % d == 0 and 2 * d * per_layer_vmem_bytes <= budget]
    if not fits:
        fits = [1]

    def score(d):
        steps = num_layers // d
        return (steps >= min_steps, steps % 2 == 0, d)

    return max(fits, key=score)


def _branch_kernel(x_ref, wp_ref, bp_ref, wccT_ref, bcc_ref,
                   pooled_ref, comb_ref):
    # x_ref:    (LB, B, H)  bf16  CLS hidden states for a block of layers
    # wp_ref:   (LB, H, H)  bf16  per-layer BertPooler dense weights
    # bp_ref:   (LB, 1, H)  f32
    # wccT_ref: (LB, CR, H) bf16  [classifier | folded evaluator] rows, lane-dense
    # bcc_ref:  (LB, 1, CR) f32
    # BertPooler: dense(H -> H) + tanh on the first token; f32 MXU accumulation.
    pooled = jnp.tanh(
        jnp.einsum('lbh,lhk->lbk', x_ref[...], wp_ref[...],
                   preferred_element_type=jnp.float32) + bp_ref[...])
    pooled_ref[...] = pooled.astype(pooled_ref.dtype)          # bf16 writeback
    # Branch classifier + folded evaluator in one matmul against the
    # transposed, sublane-packed (CR = NL+NE padded to 8) weight slab:
    #   comb[..., :NL]      = classifier logits
    #   comb[..., NL:NL+NE] = evaluator logits
    comb_ref[...] = (
        jnp.einsum('lbh,lch->lbc', pooled.astype(wccT_ref.dtype), wccT_ref[...],
                   preferred_element_type=jnp.float32) + bcc_ref[...])


def branches_pallas(hidden_cls, wp, bp, wccT, bcc):
    """hidden_cls (L,B,H) bf16, wp (L,H,H) bf16, bp (L,1,H) f32,
    wccT (L,CR,H) bf16, bcc (L,1,CR) f32.
    Returns pooled (L,B,H) bf16 and combined logits (L,B,CR) f32."""
    L, B, H = hidden_cls.shape
    CR = wccT.shape[1]

    budget, vmem_limit = _vmem_budget_and_limit()

    bf16 = jnp.dtype(jnp.bfloat16).itemsize
    # VMEM footprint per layer (incl. in-kernel f32 pooled intermediate).
    per_layer_vmem = (H * H * bf16            # wp (dominant stream)
                      + CR * H * bf16         # wccT
                      + B * H * bf16          # x
                      + (H + CR) * 4          # biases
                      + B * H * bf16          # pooled out (bf16)
                      + B * CR * 4            # comb out (f32)
                      + B * H * 4)            # in-kernel f32 pooled intermediate
    LB = _pick_layer_block(L, per_layer_vmem, budget)
    grid = (L // LB,)

    # HBM bytes actually moved per layer (for the scheduler hint).
    per_layer_hbm = (H * H * bf16 + CR * H * bf16 + B * H * bf16
                     + (H + CR) * 4 + B * H * bf16 + B * CR * 4)

    return pl.pallas_call(
        _branch_kernel,
        out_shape=(
            jax.ShapeDtypeStruct((L, B, H), jnp.bfloat16),
            jax.ShapeDtypeStruct((L, B, CR), jnp.float32),
        ),
        grid=grid,
        in_specs=[
            pl.BlockSpec((LB, B, H), lambda g: (g, 0, 0)),     # CLS hidden
            pl.BlockSpec((LB, H, H), lambda g: (g, 0, 0)),     # pooler weights
            pl.BlockSpec((LB, 1, H), lambda g: (g, 0, 0)),     # pooler bias
            pl.BlockSpec((LB, CR, H), lambda g: (g, 0, 0)),    # classifier(+eval) slab
            pl.BlockSpec((LB, 1, CR), lambda g: (g, 0, 0)),    # classifier(+eval) bias
        ],
        out_specs=(
            pl.BlockSpec((LB, B, H), lambda g: (g, 0, 0)),
            pl.BlockSpec((LB, B, CR), lambda g: (g, 0, 0)),
        ),
        compiler_params=pltpu.CompilerParams(
            dimension_semantics=("parallel",),   # layer blocks shard across TCs
            vmem_limit_bytes=vmem_limit),
        cost_estimate=pl.CostEstimate(
            flops=2 * L * B * H * (H + CR),
            transcendentals=L * B * H,
            bytes_accessed=L * per_layer_hbm),
    )(hidden_cls, wp, bp, wccT, bcc)


def prepare_params(params):
    """One-time weight preparation (done at model load, NOT per forward):
    bf16 casts, evaluator fold, and transposed sublane-packed classifier slab."""
    wp, bp, wc, bc, we, be = (params["wp"], params["bp"], params["wc"],
                              params["bc"], params["we"], params["be"])
    L, H, NL = wc.shape
    NE = we.shape[-1]
    CR = _round_up(NL + NE, _SUBLANE)

    # Fold the shared evaluator classifier into the per-layer branch classifier:
    #   eval = (pooled @ wc + bc) @ we + be = pooled @ (wc @ we) + (bc @ we + be)
    # (valid: the reference feeds raw classifier logits straight to the evaluator)
    we_f32 = we.astype(jnp.float32)
    wc_f32 = wc.astype(jnp.float32)
    wc_eval = jnp.einsum('lhn,ne->lhe', wc_f32, we_f32)                    # (L,H,NE)
    bc_eval = (jnp.einsum('lxn,ne->lxe', bc.astype(jnp.float32), we_f32)
               + be.astype(jnp.float32))                                   # (L,1,NE)

    # Pack [classifier | evaluator], pad the label axis only to 8 sublanes,
    # and transpose so H (a lane-multiple in real configs) is the lane axis.
    wcc = jnp.concatenate([wc_f32, wc_eval], axis=-1)                      # (L,H,NL+NE)
    wcc = jnp.pad(wcc, ((0, 0), (0, 0), (0, CR - NL - NE)))
    wccT = jnp.transpose(wcc, (0, 2, 1)).astype(jnp.bfloat16)              # (L,CR,H)

    bcc = jnp.concatenate([bc.astype(jnp.float32), bc_eval], axis=-1)
    bcc = jnp.pad(bcc, ((0, 0), (0, 0), (0, CR - NL - NE)))                # (L,1,CR)

    return {
        "wp": wp.astype(jnp.bfloat16),
        "bp": bp.astype(jnp.float32),
        "wccT": wccT,
        "bcc": bcc,
        "num_labels": int(NL),
        "num_labels_evaluator": int(NE),
    }


@functools.partial(jax.jit, static_argnames=("num_labels", "num_labels_evaluator"))
def _branches_device(wp, bp, wccT, bcc, hidden_cls, labels, *,
                     num_labels, num_labels_evaluator):
    """All device-side math for BranchesLayer.forward (no host syncs)."""
    NL, NE = num_labels, num_labels_evaluator
    L, B, H = hidden_cls.shape

    # Pad the tiny CLS batch to a sublane multiple (8) -> unmasked loads/stores.
    Bp = _round_up(max(B, 1), _SUBLANE)
    if Bp != B:
        hidden_cls = jnp.pad(hidden_cls, ((0, 0), (0, Bp - B), (0, 0)))

    pooled_p, comb_p = branches_pallas(
        hidden_cls.astype(jnp.bfloat16), wp, bp, wccT, bcc)

    pooled = pooled_p[:, :B, :]                       # (L, B, H)  bf16
    logits = comb_p[:, :B, :NL]                       # (L, B, NL) f32
    logits_eval = comb_p[:, :B, NL:NL + NE]           # (L, B, NE) f32

    # Device-side argmax + correctness flags (no host numpy round trip).
    pred = jnp.argmax(logits, axis=-1)                        # (L, B)
    correct = pred == labels[None, :].astype(pred.dtype)      # (L, B) bool
    labels_eval = correct.astype(jnp.int32)                   # torch.long -> int32
    all_correct = jnp.all(correct, axis=1)                    # (L,)
    return pooled, logits, logits_eval, labels_eval, all_correct


def branches_layer_forward(prepared, hidden_tokens_from_bert, output_tokens_from_bert,
                           attention_mask, labels):
    """Mirrors BranchesLayer.forward (share_branch_weights=False path)."""
    L = prepared["wp"].shape[0]
    # "We pool the model by taking the hidden state corresponding to the first
    # token" of encoder layers 1..L (layer 0 = embedding output is skipped).
    hidden_cls = hidden_tokens_from_bert[1:L + 1, :, 0, :]          # (L, B, H)

    pooled, logits, logits_eval, labels_eval, all_correct = _branches_device(
        prepared["wp"], prepared["bp"], prepared["wccT"], prepared["bcc"],
        hidden_cls, labels,
        num_labels=prepared["num_labels"],
        num_labels_evaluator=prepared["num_labels_evaluator"])

    logits_branches = [logits[l] for l in range(L)]
    logits_branches_evaluator = [logits_eval[l] for l in range(L)]
    labels_branch_evaluator = [labels_eval[l] for l in range(L)]

    # The only host sync: an (L,)-bool vector driving the dynamic-shape concat.
    keep = np.asarray(jax.device_get(all_correct))

    pooled_keep = [pooled[l][:, None, :] for l in range(L) if keep[l]]
    if len(pooled_keep) != 0:
        pooled_cat = jnp.concatenate(pooled_keep, axis=1)            # (B, n_kept, H)
        bs, seq_len, _ = pooled_cat.shape
        attention_mask_branches = jnp.ones((bs, seq_len), dtype=attention_mask.dtype)
        attention_mask = jnp.concatenate((attention_mask_branches, attention_mask), axis=1)
        output_tokens_from_bert = jnp.concatenate(
            (output_tokens_from_bert, pooled_cat.astype(output_tokens_from_bert.dtype)),
            axis=1)

    return (output_tokens_from_bert, attention_mask, logits_branches,
            logits_branches_evaluator, labels_branch_evaluator)


def init_params(key, num_layers, hidden_size, num_labels, num_labels_evaluator):
    ks = jax.random.split(key, 6)
    s = 0.02
    return {
        # per-layer BertPooler dense, stored (H_in, H_out) so the kernel does x @ W
        "wp": s * jax.random.normal(
            ks[0], (num_layers, hidden_size, hidden_size), jnp.float32),
        "bp": s * jax.random.normal(ks[1], (num_layers, 1, hidden_size), jnp.float32),
        # per-layer branch classifier Linear(H -> num_labels)
        "wc": s * jax.random.normal(
            ks[2], (num_layers, hidden_size, num_labels), jnp.float32),
        "bc": s * jax.random.normal(ks[3], (num_layers, 1, num_labels), jnp.float32),
        # shared evaluator classifier Linear(num_labels -> num_labels_evaluator)
        "we": s * jax.random.normal(
            ks[4], (num_labels, num_labels_evaluator), jnp.float32),
        "be": s * jax.random.normal(ks[5], (1, num_labels_evaluator), jnp.float32),
    }


if __name__ == "__main__":
    # small config: num_hidden_layers=4, hidden_size=32, num_labels=3, num_labels_evaluator=2
    L, B, S, H = 4, 4, 8, 32
    NL, NE = 3, 2

    key = jax.random.PRNGKey(0)
    k_h, k_o, k_lab, k_par = jax.random.split(key, 4)

    hidden_tokens_from_bert = jax.random.normal(k_h, (L + 1, B, S, H), jnp.float32)
    output_tokens_from_bert = jax.random.normal(k_o, (B, S, H), jnp.float32)
    attention_mask = jnp.ones((B, S), dtype=jnp.int32)
    labels = jax.random.randint(k_lab, (B,), 0, NL, dtype=jnp.int32)

    params = init_params(k_par, L, H, NL, NE)
    prepared = prepare_params(params)          # one-time weight packing (model load)

    out_tokens, attn_mask, logits_branches, logits_branches_eval, labels_eval = \
        branches_layer_forward(prepared, hidden_tokens_from_bert,
                               output_tokens_from_bert, attention_mask, labels)

    jax.block_until_ready(out_tokens)
    jax.block_until_ready(attn_mask)
    jax.block_until_ready(logits_branches)
    jax.block_until_ready(logits_branches_eval)
    jax.block_until_ready(labels_eval)

    # sanity: shapes of per-branch outputs
    assert all(lg.shape == (B, NL) for lg in logits_branches)
    assert all(lg.shape == (B, NE) for lg in logits_branches_eval)
    assert all(le.shape == (B,) for le in labels_eval)
    assert out_tokens.shape[0] == B and out_tokens.shape[2] == H
    assert attn_mask.shape[0] == B
    assert attn_mask.shape[1] == out_tokens.shape[1]

    print("KERNEL_OK")
</pallas_src>

<mosaic_0001>
module attributes {stable_mosaic.version = 11 : i64} {
  func.func @_branch_kernel(%arg0: i32, %arg1: memref<1x8x32xbf16, #tpu.memory_space<vmem>>, %arg2: memref<1x32x32xbf16, #tpu.memory_space<vmem>>, %arg3: memref<1x1x32xf32, #tpu.memory_space<vmem>>, %arg4: memref<1x8x32xbf16, #tpu.memory_space<vmem>>, %arg5: memref<1x1x8xf32, #tpu.memory_space<vmem>>, %arg6: memref<1x8x32xbf16, #tpu.memory_space<vmem>>, %arg7: memref<1x8x8xf32, #tpu.memory_space<vmem>>) attributes {dimension_semantics = [#tpu.dimension_semantics<parallel>], iteration_bounds = array<i64: 4>, scalar_prefetch = 0 : i64, scratch_operands = 0 : i64, tpu.core_type = #tpu.core_type<tc>, window_params = [{transform_indices = @transform_0, window_bounds = array<i64: 1, 8, 32>}, {transform_indices = @transform_1, window_bounds = array<i64: 1, 32, 32>}, {transform_indices = @transform_2, window_bounds = array<i64: 1, 1, 32>}, {transform_indices = @transform_3, window_bounds = array<i64: 1, 8, 32>}, {transform_indices = @transform_4, window_bounds = array<i64: 1, 1, 8>}, {transform_indices = @transform_5, window_bounds = array<i64: 1, 8, 32>}, {transform_indices = @transform_6, window_bounds = array<i64: 1, 8, 8>}]} {
    %c0 = arith.constant 0 : index
    %c0_0 = arith.constant 0 : index
    %c0_1 = arith.constant 0 : index
    %0 = vector.load %arg1[%c0, %c0_0, %c0_1] : memref<1x8x32xbf16, #tpu.memory_space<vmem>>, vector<1x8x32xbf16>
    %c0_2 = arith.constant 0 : index
    %c0_3 = arith.constant 0 : index
    %c0_4 = arith.constant 0 : index
    %1 = vector.load %arg2[%c0_2, %c0_3, %c0_4] : memref<1x32x32xbf16, #tpu.memory_space<vmem>>, vector<1x32x32xbf16>
    "tpu.trace_start"() <{level = 10 : i32, message = "lbh,lhk->lbk"}> : () -> ()
    %cst = arith.constant dense<0.000000e+00> : vector<1x8x32xf32>
    %2 = tpu.matmul %0, %1, %cst {dimension_numbers = #tpu.dot_dimension_numbers<[2], [1], [1], [2], [0, 0, 0, 1, 1, 2], [0], [0]>} : vector<1x8x32xbf16>, vector<1x32x32xbf16>, vector<1x8x32xf32> -> vector<1x8x32xf32>
    "tpu.trace_stop"() : () -> ()
    %c0_5 = arith.constant 0 : index
    %c0_6 = arith.constant 0 : index
    %c0_7 = arith.constant 0 : index
    %3 = vector.load %arg3[%c0_5, %c0_6, %c0_7] : memref<1x1x32xf32, #tpu.memory_space<vmem>>, vector<1x1x32xf32>
    %4 = vector.broadcast %3 : vector<1x1x32xf32> to vector<1x8x32xf32>
    %5 = arith.addf %2, %4 : vector<1x8x32xf32>
    %6 = math.tanh %5 : vector<1x8x32xf32>
    %7 = arith.truncf %6 : vector<1x8x32xf32> to vector<1x8x32xbf16>
    %c0_8 = arith.constant 0 : index
    %c0_9 = arith.constant 0 : index
    %c0_10 = arith.constant 0 : index
    %8 = vector.load %arg6[%c0_8, %c0_9, %c0_10] : memref<1x8x32xbf16, #tpu.memory_space<vmem>>, vector<1x8x32xbf16>
    tpu.vector_store %arg6[%c0_8, %c0_9, %c0_10], %7 {strides = array<i32>} : memref<1x8x32xbf16, #tpu.memory_space<vmem>>, vector<1x8x32xbf16>,
    %9 = arith.truncf %6 : vector<1x8x32xf32> to vector<1x8x32xbf16>
    %c0_11 = arith.constant 0 : index
    %c0_12 = arith.constant 0 : index
    %c0_13 = arith.constant 0 : index
    %10 = vector.load %arg4[%c0_11, %c0_12, %c0_13] : memref<1x8x32xbf16, #tpu.memory_space<vmem>>, vector<1x8x32xbf16>
    "tpu.trace_start"() <{level = 10 : i32, message = "lbh,lch->lbc"}> : () -> ()
    %cst_14 = arith.constant dense<0.000000e+00> : vector<1x8x8xf32>
    %11 = tpu.matmul %9, %10, %cst_14 {dimension_numbers = #tpu.dot_dimension_numbers<[2], [2], [1], [1], [0, 0, 0, 1, 1, 1], [0], [0]>} : vector<1x8x32xbf16>, vector<1x8x32xbf16>, vector<1x8x8xf32> -> vector<1x8x8xf32>
    "tpu.trace_stop"() : () -> ()
    %c0_15 = arith.constant 0 : index
    %c0_16 = arith.constant 0 : index
    %c0_17 = arith.constant 0 : index
    %12 = vector.load %arg5[%c0_15, %c0_16, %c0_17] : memref<1x1x8xf32, #tpu.memory_space<vmem>>, vector<1x1x8xf32>
    %13 = vector.broadcast %12 : vector<1x1x8xf32> to vector<1x8x8xf32>
    %14 = arith.addf %11, %13 : vector<1x8x8xf32>
    %c0_18 = arith.constant 0 : index
    %c0_19 = arith.constant 0 : index
    %c0_20 = arith.constant 0 : index
    %15 = vector.load %arg7[%c0_18, %c0_19, %c0_20] : memref<1x8x8xf32, #tpu.memory_space<vmem>>, vector<1x8x8xf32>
    tpu.vector_store %arg7[%c0_18, %c0_19, %c0_20], %14 {strides = array<i32>} : memref<1x8x8xf32, #tpu.memory_space<vmem>>, vector<1x8x8xf32>,
    return
  }
  func.func @transform_0(%arg0: i32) -> (i32, i32, i32) {
    %c0_i32 = arith.constant 0 : i32
    %c0_i32_0 = arith.constant 0 : i32
    %c0_i32_1 = arith.constant 0 : i32
    return %arg0, %c0_i32, %c0_i32_0 : i32, i32, i32
  }
  func.func @transform_1(%arg0: i32) -> (i32, i32, i32) {
    %c0_i32 = arith.constant 0 : i32
    %c0_i32_0 = arith.constant 0 : i32
    %c0_i32_1 = arith.constant 0 : i32
    return %arg0, %c0_i32, %c0_i32_0 : i32, i32, i32
  }
  func.func @transform_2(%arg0: i32) -> (i32, i32, i32) {
    %c0_i32 = arith.constant 0 : i32
    %c0_i32_0 = arith.constant 0 : i32
    %c0_i32_1 = arith.constant 0 : i32
    return %arg0, %c0_i32, %c0_i32_0 : i32, i32, i32
  }
  func.func @transform_3(%arg0: i32) -> (i32, i32, i32) {
    %c0_i32 = arith.constant 0 : i32
    %c0_i32_0 = arith.constant 0 : i32
    %c0_i32_1 = arith.constant 0 : i32
    return %arg0, %c0_i32, %c0_i32_0 : i32, i32, i32
  }
  func.func @transform_4(%arg0: i32) -> (i32, i32, i32) {
    %c0_i32 = arith.constant 0 : i32
    %c0_i32_0 = arith.constant 0 : i32
    %c0_i32_1 = arith.constant 0 : i32
    return %arg0, %c0_i32, %c0_i32_0 : i32, i32, i32
  }
  func.func @transform_5(%arg0: i32) -> (i32, i32, i32) {
    %c0_i32 = arith.constant 0 : i32
    %c0_i32_0 = arith.constant 0 : i32
    %c0_i32_1 = arith.constant 0 : i32
    return %arg0, %c0_i32, %c0_i32_0 : i32, i32, i32
  }
  func.func @transform_6(%arg0: i32) -> (i32, i32, i32) {
    %c0_i32 = arith.constant 0 : i32
    %c0_i32_0 = arith.constant 0 : i32
    %c0_i32_1 = arith.constant 0 : i32
    return %arg0, %c0_i32, %c0_i32_0 : i32, i32, i32
  }
}

</mosaic_0001>

<bundles_post_ra>
// kernel: _branches_device.1
= control target key start
LH: loop header
LB: loop body
LE: loop exit
PB: predicated region body
PF: predicated region fallthrough
CT: control target
= control target key end

     0   :  { %12 = vsyncpa [#allocation3], 0  ;;  %s1134_s0 = inlined_call_operand.vmem [shape: bf16[4,8,32], index: 0, kind: input, shape index: {}]   ;;  %s1135_s1 = inlined_call_operand.vmem [shape: bf16[4,32,32], index: 1, kind: input, shape index: {}]   ;;  %s1136_s2 = inlined_call_operand.hbm [shape: f32[4,1,32], index: 2, kind: input, shape index: {}]   ;;  %s1137_s3 = inlined_call_operand.hbm [shape: bf16[4,8,32], index: 3, kind: input, shape index: {}]   ;;  %s1138_s4 = inlined_call_operand.hbm [shape: f32[4,1,8], index: 4, kind: input, shape index: {}]   ;;  %s1139_s5 = inlined_call_operand.vmem [shape: bf16[4,8,32], index: 5, kind: output, shape index: {0}]   ;;  %s1140_s6 = inlined_call_operand.vmem [shape: f32[4,8,8], index: 6, kind: output, shape index: {1}]  }
   0x1   :  { %14 = vsyncpa [#allocation3 + $0x1], 0 }
   0x2   :  { %15 = vsyncpa [#allocation5], 0 }
   0x3   :  { %17 = vsyncpa [#allocation5 + $0x1], 0  ;;  %s933_s21 = smov 0   ;;  %s935_s22 = smov 0  }
   0x4   :  { %s937_s23 = smov 0   ;;  %s939_s24 = smov 0  }
   0x5 LB: > { %s952_s25 = sadd.s32 4294967295, %s891_s24   ;;  %s955_s26 = sadd.s32 1, %s891_s24   ;;  %s891_s24 = sphi %s939_s24, %s1157_s24   ;;  %s887_s23 = sphi %s937_s23, %s1156_s23   ;;  %s883_s22 = sphi %s935_s22, %s1155_s22   ;;  %s879_s21 = sphi %s933_s21, %s1154_s21  }
   0x6   : > { %s79_s27 = ssub.s32 %s891_s24, %s955_s26  ;;  %s82_s28 = sadd.s32 1, %s887_s23 }
   0x7   : > { %p80_p0 = scmp.eq.s32.totalorder %s79_s27, 0  ;;  %p89_p1 = scmp.ne.s32.totalorder %s887_s23, %s883_s22 }
   0x8   : > { %p90_p2 = scmp.eq.s32.totalorder %s891_s24, 0  ;;  %p95_p3 = scmp.ne.s32.totalorder %s883_s22, %s879_s21 }
   0x9   : > { %s965_s29 = scalar_select %p80_p0, %s887_s23, %s82_s28  }
   0xa   : > { %p91_p4 = por %p90_p2, %p89_p1  ;;  %p96_p5 = scmp.eq.s32.totalorder %s952_s25, 0 }
   0xb   : > { %p724_p6 = scmp.lt.s32.totalorder %s891_s24, 4  ;;  %s974_s7 = sand.u32 1, %s887_s23  }
   0xc   : > { %p969_p7 = por %p96_p5, %p95_p3  ;;  %s255_s9 = sand.u32 1, %s891_s24  }
   0xd   : > { %p976_p8 = pnand %p724_p6, %p91_p4  ;;  %s670_s10 = sshll.u32 %s974_s7, 2 }
   0xe   : > { %s1145_s30 = scalar_select %p969_p7, 1, 0 }
   0xf   : > { %s1146_s8 = scalar_select %p976_p8, 1, 0 }
  0x10   : > { %s671_s11 = sshll.u32 %s891_s24, 6  ;;  %s259_s12 = scalar_lea.vmem [#allocation4], %s670_s10 }
  0x11   : > { %s266_s13 = sshll.u32 %s259_s12, 4  ;;  %s986_s16 = scalar_lea.hbm %s1137_s3, %s671_s11  ;;  %s988_s13 = int_to_ptr.vmem [resolvable:$true] %s266_s13 }
  0x12   : > { %s990_s17 = scalar_lea.sflag [#allocation5], %s255_s9  ;;  %s763_s18 = scalar_lea.hbm %s986_s16, 64 }
  0x13   : > { %p764_p9 = scmp.ne.s32.totalorder %s986_s16, %s763_s18  ;;  %p996_p10 = pneg %p976_p8 }
  0x14   : > { %s768_s27 = scalar_lea.hbm %s1137_s3, 256  ;;  %p769_p13 = scmp.lt.u32.totalorder %s986_s16, %s1137_s3 }
  0x15   : > { %p766_p11 = pnand %p996_p10, %p764_p9  ;;  %p770_p0 = scmp.lt.u32.totalorder %s768_s27, %s763_s18 }
  0x16   : > { %p772_p2 = scmp.lt.u32.totalorder %s763_s18, %s986_s16 }
  0x17   : > { %p767_p12 = pneg %p766_p11  ;;  %p771_p1 = por %p770_p0, %p769_p13 }
  0x19   : > { %p773_p3 = por %p772_p2, %p771_p1 }
  0x1b   : > { %p774_p4 = pnand %p773_p3, %p767_p12 }
  0x1d   : > { %777 = shalt.err (!%p774_p4)
}
  0x1e   : > { %s778_s9 = scalar_lea.vmem %s988_s13, 64  ;;  %s893_s11 = smov [#allocation4]  }
  0x1f   : > { %p779_p5 = scmp.ne.s32.totalorder %s988_s13, %s778_s9  ;;  %s783_s12 = sshll.u32 %s893_s11, 4  ;;  %s784_s12 = int_to_ptr.vmem [resolvable:$false] %s783_s12 }
  0x20   : > { %s785_s14 = scalar_lea.vmem %s784_s12, 128  ;;  %p786_p11 = scmp.lt.s32.totalorder %s988_s13, %s784_s12 }
  0x21   : > { %p781_p6 = pnand %p779_p5, %p996_p10  ;;  %p787_p7 = scmp.lt.s32.totalorder %s785_s14, %s778_s9 }
  0x23   : > { %p782_p9 = pneg %p781_p6  ;;  %p788_p13 = por %p787_p7, %p786_p11 }
  0x25   : > { %p789_p0 = pnand %p788_p13, %p782_p9 }
  0x27   : > { %792 = shalt.err (!%p789_p0)
}
  0x28   : > { %720 = dma.hbm_to_vmem [thread:$0]  (!%p976_p8), %s986_s16, 64, %s988_s13, %s990_s17  }
  0x29   : > { %p673_p12 = scmp.ge.s32.totalorder %s891_s24, 1  ;;  %p288_p1 = scmp.lt.s32.totalorder %s891_s24, 5 }
  0x2a   : > { %s1142_s18 = sshll.u32 %s891_s24, 4  ;;  %s241_s28 = scalar_lea.vmem [#allocation2], %s974_s7 }
  0x2b   : > { %p1022_p2 = pnand %p673_p12, %p288_p1  ;;  %s1032_s27 = scalar_lea.hbm %s1136_s2, %s1142_s18 }
  0x2c   : > { %s248_s10 = sshll.u32 %s241_s28, 4  ;;  %s239_s13 = scalar_lea.sflag [#allocation3], %s974_s7  ;;  %s249_s10 = int_to_ptr.vmem [resolvable:$true] %s248_s10 }
  0x2d   : > { %s1148_s15 = scalar_select %p1022_p2, 1, 0 }
  0x2e   : > { %s793_s16 = scalar_lea.hbm %s1032_s27, 16  ;;  %s798_s12 = scalar_lea.hbm %s1136_s2, 64 }
  0x2f   : > { %p794_p7 = scmp.ne.s32.totalorder %s1032_s27, %s793_s16  ;;  %p799_p5 = scmp.lt.u32.totalorder %s1032_s27, %s1136_s2 }
  0x30   : > { %p800_p6 = scmp.lt.u32.totalorder %s798_s12, %s793_s16  ;;  %p802_p11 = scmp.lt.u32.totalorder %s793_s16, %s1032_s27 }
  0x31   : > { %p796_p3 = pnand %p794_p7, %p996_p10 }
  0x32   : > { %p801_p9 = por %p800_p6, %p799_p5 }
  0x33   : > { %p797_p4 = pneg %p796_p3 }
  0x34   : > { %p803_p13 = por %p802_p11, %p801_p9 }
  0x36   : > { %p804_p0 = pnand %p803_p13, %p797_p4 }
  0x38   : > { %807 = shalt.err (!%p804_p0)
}
  0x39   : > { %s808_s21 = scalar_lea.vmem %s249_s10, 16  ;;  %s894_s28 = smov [#allocation2]  }
  0x3a   : > { %p809_p12 = scmp.ne.s32.totalorder %s249_s10, %s808_s21  ;;  %s813_s18 = sshll.u32 %s894_s28, 4  ;;  %s814_s18 = int_to_ptr.vmem [resolvable:$false] %s813_s18 }
  0x3b   : > { %s815_s9 = scalar_lea.vmem %s814_s18, 32  ;;  %p816_p3 = scmp.lt.s32.totalorder %s249_s10, %s814_s18 }
  0x3c   : > { %p811_p1 = pnand %p809_p12, %p996_p10  ;;  %p817_p2 = scmp.lt.s32.totalorder %s815_s9, %s808_s21 }
  0x3e   : > { %p812_p7 = pneg %p811_p1  ;;  %p818_p8 = por %p817_p2, %p816_p3 }
  0x40   : > { %p819_p5 = pnand %p818_p8, %p812_p7 }
  0x42   : > { %822 = shalt.err (!%p819_p5)
}
  0x43   : > { %p1149_p6 = scmp.ne.s32.totalorder %s1146_s8, 0  ;;  %s1150_s16 = sshll.u32 %s891_s24, 4 }
  0x44   : > { %s1058_s14 = scalar_lea.hbm %s1138_s4, %s1150_s16  ;;  %s276_s18 = scalar_lea.vmem [#allocation6], %s974_s7 }
  0x45   : > { %717 = dma.hbm_to_vmem [thread:$0]  (!%p1149_p6), %s1032_s27, 16, %s249_s10, %s239_s13  }
  0x46   : > { %s283_s20 = sshll.u32 %s276_s18, 4  ;;  %s823_s21 = scalar_lea.hbm %s1058_s14, 16  ;;  %s284_s20 = int_to_ptr.vmem [resolvable:$true] %s283_s20 }
  0x47   : > { %p824_p8 = scmp.ne.s32.totalorder %s1058_s14, %s823_s21  ;;  %s828_s24 = scalar_lea.hbm %s1138_s4, 64 }
  0x48   : > { %p829_p9 = scmp.lt.u32.totalorder %s1058_s14, %s1138_s4  ;;  %p830_p11 = scmp.lt.u32.totalorder %s828_s24, %s823_s21 }
  0x49   : > { %p826_p2 = pnand %p824_p8, %p996_p10  ;;  %p832_p0 = scmp.lt.u32.totalorder %s823_s21, %s1058_s14 }
  0x4a   : > { %p831_p13 = por %p830_p11, %p829_p9 }
  0x4b   : > { %p827_p4 = pneg %p826_p2 }
  0x4c   : > { %p833_p12 = por %p832_p0, %p831_p13 }
  0x4e   : > { %p834_p1 = pnand %p833_p12, %p827_p4 }
  0x50   : > { %837 = shalt.err (!%p834_p1)
}
  0x51   : > { %s838_s7 = scalar_lea.vmem %s284_s20, 16  ;;  %s895_s9 = smov [#allocation6]  }
  0x52   : > { %p839_p7 = scmp.ne.s32.totalorder %s284_s20, %s838_s7  ;;  %s843_s16 = sshll.u32 %s895_s9, 4  ;;  %s844_s16 = int_to_ptr.vmem [resolvable:$false] %s843_s16 }
  0x53   : > { %s845_s11 = scalar_lea.vmem %s844_s16, 32  ;;  %p846_p8 = scmp.lt.s32.totalorder %s284_s20, %s844_s16 }
  0x54   : > { %p841_p3 = pnand %p839_p7, %p996_p10  ;;  %p847_p2 = scmp.lt.s32.totalorder %s845_s11, %s838_s7 }
  0x56   : > { %p842_p5 = pneg %p841_p3  ;;  %p848_p6 = por %p847_p2, %p846_p8 }
  0x58   : > { %p849_p9 = pnand %p848_p6, %p842_p5 }
  0x5a   : > { %852 = shalt.err (!%p849_p9)
}
  0x5b   : > { %p1151_p11 = scmp.ne.s32.totalorder %s1146_s8, 0  ;;  %p1152_p4 = scmp.ne.s32.totalorder %s1148_s15, 0 }
  0x5c   : > { %s1082_s19 = sand.u32 (!%p1152_p4), 1, %s883_s22   ;;  %p1153_p10 = scmp.ne.s32.totalorder (!%p1152_p4), %s1145_s30, 0 }
  0x5d   : > { %723 = dma.hbm_to_vmem [thread:$0]  (!%p1151_p11), %s1058_s14, 16, %s284_s20, %s990_s17  }
  0x5e   : > { %292 = sbr.rel (%p1152_p4) target bundleno = 560 (0x230), region = 40  ;;  %s295_s12 = scalar_lea.sflag (!%p1152_p4), [#allocation3], %s1082_s19 }
  0x5f   : > { %s297_s18 = scalar_lea.vmem (!%p1152_p4), [#allocation2], %s1082_s19 }
  0x65   : > { %870 = dma.done.wait (%p1153_p10), %s295_s12, 16  }
  0x66   : > { %872 = vsyncadd (%p1153_p10), %s295_s12, 4294967280  ;;  %s302_s8 = sand.u32 1, %s952_s25   ;;  %s674_s17 = sshll.u32 %s1082_s19, 2 }
  0x67   : > { %s303_s15 = scalar_lea.sflag [#allocation5], %s302_s8  ;;  %s306_s14 = scalar_lea.vmem [#allocation4], %s674_s17 }
  0x68   : > { %874 = dma.done.wait (%p1153_p10), %s303_s15, 80  }
  0x69   : > { %876 = vsyncadd (%p1153_p10), %s303_s15, 4294967216  ;;  %p363_p6 = scmp.lt.s32.totalorder %s952_s25, 3  ;;  %v896_v0 = vmov 0.0   ;;  %vm897_vm0 = vmmov 0   ;;  %vm405_vm1 = vcmask 261120   ;;  %vm451_vm2 = vcmask 257024  }
  0x6a   : > { %694 = vmatprep.subr.bf16.mxu0 %v896_v0  ;;  %698 = vmatprep.mubr.msk.bf16.mxu0 %vm897_vm0, %v896_v0  ;;  %v453_v4 = vld [vmem:[%s306_s14] sm:$0xf]  ;;  %v680_v6 = vld [vmem:[%s297_s18] ss:$0 sm:$0xff]  ;;  %s314_s12 = scalar_lea.vmem [#allocation6], %s1082_s19  ;;  %vm507_vm3 = vcmask 64512  }
  0x6b   : > { %s1159_s25 = smov (!%p363_p6, %s952_s25), 3  ;;  %702 = vmatprep.subr.bf16.mxu1 %v896_v0  ;;  %704 = vmatprep.mubr.msk.bf16.mxu1 %vm897_vm0, %v896_v0  ;;  %v465_v5 = vsel %vm405_vm1, %v453_v4, 0  ;;  %v684_v14 = vld [vmem:[%s314_s12] ss:$0 sm:$0xff] }
  0x6c   : > { %s688_s20 = sshll.u32 %s1159_s25, 4  ;;  %s675_s27 = sshll.u32 %s1159_s25, 2  ;;  %703 = vmatpush3.bf16.xpose.msra.mxu1 %v465_v5 }
  0x6d   : > { %s371_s30 = scalar_lea.vmem %s1135_s1, %s688_s20  ;;  %s366_s13 = scalar_lea.vmem %s1134_s0, %s675_s27 }
  0x6e   : > { %v759_v1 = vld [vmem:[%s371_s30] sm:$0xff]   ;;  %v760_v2 = vld [vmem:[%s371_s30 + $0x8] sm:$0xff]   ;;  %s375_s16 = scalar_lea.vmem %s1139_s5, %s675_s27  ;;  %s679_s11 = sshll.u32 %s1159_s25, 3 }
  0x6f   : > { %695 = vmatpush3.bf16.msra.mxu0 %v759_v1  ;;  %v381_v3 = vld [vmem:[%s366_s13] sm:$0xf]  ;;  %s379_s17 = scalar_lea.vmem %s1140_s6, %s679_s11 }
  0x70   : > { %696 = vmatprep.subr.bf16.mxu0 %v896_v0 }
  0x73   : > { %697 = vmatpush3.bf16.msra.mxu0 %v760_v2 }
  0x76   : > { %699 = vmatmul.mubr.msk.bf16.vlgmr.msra.gmra.mrb[0].mxu0 %vm405_vm1, %v381_v3 }
 0x149   : > { %v443_v7 = vpop.f32.mrb[0].mxu0 }
 0x14a   : > { %v444_v8 = vadd.f32 %v680_v6, %v443_v7  ;;  %v700_v9 = vpop.f32.mrb[1].mxu0 }
 0x14b   : > { %v446_v10 = vpop.f32.mrb[2].mxu0 }
 0x14c   : > { %761 = vtanh.f32 %v444_v8  ;;  %v701_v11 = vpop.f32.mrb[3].mxu0 }
 0x156   : > { %v762_v12 = vpop.eup %761 }
 0x157   : > { %v450_v13 = vpack.c.bf16 %v762_v12, %v762_v12 }
 0x159   : > { %452 = vst.msk [vmem:[%s375_s16] sm:$0xf] %vm451_vm2, %v450_v13  ;;  %705 = vmatmul.mubr.msk.bf16.vlgmr.msra.gmra.mrb[0].mxu1 %vm405_vm1, %v450_v13 }
 0x22c   : > { %v501_v15 = vpop.f32.mrb[0].mxu1 }
 0x22d   : > { %v502_v16 = vadd.f32 %v684_v14, %v501_v15  ;;  %v706_v17 = vpop.f32.mrb[1].mxu1 }
 0x22e   : > { %v504_v18 = vpop.f32.mrb[2].mxu1 }
 0x22f   : > { %508 = vst.msk [vmem:[%s379_s17] sm:$0xff] %vm507_vm3, %v502_v16  ;;  %v707_v19 = vpop.f32.mrb[3].mxu1 }
 0x230 PF: > { %p20_p13 = scmp.ge.s32.totalorder %s955_s26, 6   ;;  %s1154_s21 = smov %s883_s22 }
 0x231   : > { %s1155_s22 = smov %s887_s23  ;;  %s1156_s23 = smov %s965_s29 }
 0x232   : > { %s1157_s24 = smov %s955_s26  ;;  %22 = sbr.rel (!%p20_p13) target bundleno = 5 (0x5), region = 122 }
 0x239   :  { %542 = vsyncpa [#allocation3], 1 }
 0x23a   :  { %544 = vsyncpa [#allocation3 + $0x1], 1 }
 0x23b   :  { %545 = vsyncpa [#allocation5], 1 }
 0x23c   :  { %547 = vsyncpa [#allocation5 + $0x1], 1 }

</bundles_post_ra>
